<compile_context>
chip_gen: v6e
topology: v6e:2x2x1
jax: 0.10.0
libtpu: 0.0.40
codegen_flags: <defaults>
</compile_context>

<pallas_src>
import jax
import jax.numpy as jnp
import numpy as np
from jax.experimental import pallas as pl
from jax.experimental.pallas import tpu as pltpu


def esn_kernel(x_ref, xnext_ref, w_ref, d_ref, o_ref, s_ref):
    # x_ref:     (bt, Tc, I)   input chunk (batch-major, matches HBM layout)
    # xnext_ref: (bt, L, I)    first rows of the NEXT time chunk (L=8), or an alias of the
    #                          current chunk when there is only one chunk (then never used)
    # w_ref:     (I, Rp)       W_in^T, reservoir axis zero-padded to a lane multiple
    # d_ref:     (1, Rp)       diagonal of the state projection (zero in the padding)
    # o_ref:     (bt, Tc, Rp)  output chunk; also the staging buffer for u
    # s_ref:     (bt, Rp)      reservoir state carried across time chunks
    c = pl.program_id(1)
    nt = pl.num_programs(1)
    bt, Tc, I = x_ref.shape
    Rp = w_ref.shape[1]

    # ---- input projection for this chunk (MXU), staged straight into the output block ----
    u = jnp.dot(x_ref[...].reshape(bt * Tc, I), w_ref[...],
                preferred_element_type=jnp.float32)
    o_ref[...] = u.reshape(bt, Tc, Rp)

    # ---- reservoir state: zero at the first time chunk of every batch block ----
    @pl.when(c == 0)
    def _():
        s_ref[...] = jnp.zeros_like(s_ref)

    d_row = d_ref[...]                       # (1, Rp): broadcast happens inside the multiply

    # ---- serial recurrence inside the chunk; state carried in registers, not VMEM ----
    #      out row j = tanh(d * s + u[row j+1]); step j reads row j+1, writes row j (no hazard)
    def step(j, s):
        u_j = o_ref[:, j + 1, :]
        s_new = jnp.tanh(s * d_row + u_j)
        o_ref[:, j, :] = s_new
        return s_new

    unroll = True if Tc <= 32 else 8
    s_last = jax.lax.fori_loop(0, Tc - 1, step, s_ref[...], unroll=unroll)

    # ---- chunk-boundary row: needs u at the first timestep of the NEXT chunk.  The torch loop
    #      never writes the final timestep, so the very last chunk's last row stays zero. ----
    u_next = jnp.dot(xnext_ref[:, 0, :], w_ref[...], preferred_element_type=jnp.float32)
    s_bound = jnp.tanh(s_last * d_row + u_next)
    is_last = c == nt - 1
    o_ref[:, Tc - 1, :] = jnp.where(is_last, 0.0, s_bound)
    s_ref[...] = s_bound                     # carried into the next time chunk (ignored if last)


def _round_up(n, m):
    return (n + m - 1) // m * m


def _pick_batch_tile(bp):
    """bp is a multiple of 8.  Prefer >=2 blocks (v7x has 2 TensorCores) and bt <= 64."""
    if bp <= 8:
        return bp
    bt = max(8, min(64, (bp // 2) // 8 * 8))
    while bp % bt:
        bt -= 8
    return bt


def _pick_time_chunk(t, bt, rp):
    """Largest multiple-of-8 divisor of t that keeps the output block around <= 4 MiB."""
    budget_rows = max(8, (4 << 20) // (bt * rp * 4))
    if t <= budget_rows:
        return t
    tc = budget_rows // 8 * 8
    while tc >= 8 and t % tc:
        tc -= 8
    # TODO(synk): pad T to the next multiple of 8 instead of falling back to a full-sequence
    # block for pathological (e.g. huge prime) sequence lengths.
    return tc if tc >= 8 else t


def _vmem_estimate_bytes(bt, tc, look_rows, i, rp):
    """Padded (sublane 8 / lane 128) footprint of the double-buffered blocks plus scratch."""
    def tile(major, sub, lane):
        return major * _round_up(sub, 8) * _round_up(lane, 128) * 4
    blocks = (tile(bt, tc, i) + tile(bt, look_rows, i) + tile(bt, tc, rp)
              + tile(1, i, rp) + tile(1, 1, rp))
    return 2 * blocks + tile(1, bt, rp)


def esn_forward(x, w_in, d, *, batch_tile=None, time_chunk=None):
    """x: (B, T, I) float32, w_in: (R, I), d: (R,).  Returns (B, T, R) float32."""
    B, T, I = x.shape
    R = w_in.shape[0]
    Rp = _round_up(R, 128)                                   # lane-dense reservoir dim

    x = x.astype(jnp.float32)
    Bp = _round_up(B, 8)
    if Bp != B:                                              # sublane-pad the batch, sliced later
        x = jnp.pad(x, ((0, Bp - B), (0, 0), (0, 0)))

    wt = jnp.zeros((I, Rp), jnp.float32).at[:, :R].set(jnp.transpose(w_in).astype(jnp.float32))
    d2 = jnp.zeros((1, Rp), jnp.float32).at[:, :R].set(d.astype(jnp.float32).reshape(1, R))

    bt = batch_tile if batch_tile is not None else _pick_batch_tile(Bp)
    tc = time_chunk if time_chunk is not None else _pick_time_chunk(T, bt, Rp)
    assert Bp % bt == 0 and bt % 8 == 0, (Bp, bt)
    assert T % tc == 0, (T, tc)
    nb, nt = Bp // bt, T // tc
    assert nt == 1 or tc % 8 == 0, (T, tc)

    # Lookahead: first rows of the next time chunk (supplies the one u row crossing the boundary).
    if nt > 1:
        look_rows = 8
        tc8, last_blk = tc // 8, T // 8 - 1
        look_spec = pl.BlockSpec(
            (bt, 8, I), lambda b, c: (b, jnp.minimum((c + 1) * tc8, last_blk), 0))
    else:                                                    # single chunk: alias (never used)
        look_rows = tc
        look_spec = pl.BlockSpec((bt, tc, I), lambda b, c: (b, 0, 0))

    vmem_limit = None
    est = _vmem_estimate_bytes(bt, tc, look_rows, I, Rp)
    if est > (24 << 20):
        try:
            cap = int(pltpu.get_tpu_info().vmem_capacity_bytes) - (8 << 20)
        except Exception:
            cap = 56 << 20                                   # conservative (v7x physical is 64 MiB)
        vmem_limit = int(min(est + (4 << 20), cap))

    cost = pl.CostEstimate(
        flops=2 * Bp * T * I * Rp,
        transcendentals=Bp * max(T - 1, 0) * Rp,
        bytes_accessed=4 * (Bp * T * I + Bp * T * Rp + I * Rp + Rp),
    )

    out_padded = pl.pallas_call(
        esn_kernel,
        out_shape=jax.ShapeDtypeStruct((Bp, T, Rp), jnp.float32),
        grid_spec=pltpu.PrefetchScalarGridSpec(
            num_scalar_prefetch=0,
            grid=(nb, nt),
            in_specs=[
                pl.BlockSpec((bt, tc, I), lambda b, c: (b, c, 0)),
                look_spec,
                pl.BlockSpec((I, Rp), lambda b, c: (0, 0)),
                pl.BlockSpec((1, Rp), lambda b, c: (0, 0)),
            ],
            out_specs=pl.BlockSpec((bt, tc, Rp), lambda b, c: (b, c, 0)),
            scratch_shapes=[pltpu.VMEM((bt, Rp), jnp.float32)],
        ),
        compiler_params=pltpu.CompilerParams(
            dimension_semantics=("parallel", "arbitrary"),
            vmem_limit_bytes=vmem_limit,
        ),
        cost_estimate=cost,
    )(x, x, wt, d2)

    return out_padded[:B, :, :R]                             # drop sublane / lane padding


def esn_reference(x, w_in, d):
    """Pure-JAX reference mirroring the PyTorch loop."""
    B, T, _ = x.shape
    R = w_in.shape[0]
    u = jnp.einsum("bti,ri->btr", x.astype(jnp.float32), w_in.astype(jnp.float32),
                   precision=jax.lax.Precision.HIGHEST)
    s = jnp.zeros((B, R), jnp.float32)
    outs = []
    for t in range(1, T):
        s = jnp.tanh(s * d[None, :] + u[:, t, :])
        outs.append(s)
    outs.append(jnp.zeros((B, R), jnp.float32))
    return jnp.stack(outs, axis=1)


if __name__ == "__main__":
    root = jax.random.PRNGKey(0)

    def run_case(case_id, B, T, I, R, tol, **overrides):
        kx, kw, kd = jax.random.split(jax.random.fold_in(root, case_id), 3)
        x = jax.random.normal(kx, (B, T, I), dtype=jnp.float32)
        w_in = jax.random.uniform(kw, (R, I), minval=-1.0, maxval=1.0, dtype=jnp.float32)
        d = jax.random.uniform(kd, (R,), minval=-1.0, maxval=1.0, dtype=jnp.float32)
        out = jax.block_until_ready(esn_forward(x, w_in, d, **overrides))
        ref = jax.block_until_ready(esn_reference(x, w_in, d))
        assert out.shape == (B, T, R), out.shape
        assert np.allclose(np.asarray(out), np.asarray(ref), atol=tol, rtol=tol), (
            f"Pallas ESN output mismatch vs reference (case {case_id})")

    # Module-default small shapes: batch=2, seq=8, input_size=16, reservoir_size=50.
    run_case(0, B=2, T=8, I=16, R=50, tol=1e-5)
    # Multi-block grid: 2 batch blocks x 4 time chunks (exercises the carried state, the
    # chunk-boundary lookahead and the parallel/arbitrary grid).  Slightly looser tolerance
    # covers MXU-vs-XLA matmul rounding accumulated through the 64-step recurrence.
    run_case(1, B=16, T=64, I=16, R=50, tol=1e-4, batch_tile=8, time_chunk=16)
    print("KERNEL_OK")
</pallas_src>

<mosaic_0001>
module attributes {stable_mosaic.version = 11 : i64} {
  func.func @esn_kernel(%arg0: i32, %arg1: i32, %arg2: memref<8x8x16xf32, #tpu.memory_space<vmem>>, %arg3: memref<8x8x16xf32, #tpu.memory_space<vmem>>, %arg4: memref<16x128xf32, #tpu.memory_space<vmem>>, %arg5: memref<1x128xf32, #tpu.memory_space<vmem>>, %arg6: memref<8x8x128xf32, #tpu.memory_space<vmem>>, %arg7: memref<8x128xf32, #tpu.memory_space<vmem>>) attributes {dimension_semantics = [#tpu.dimension_semantics<parallel>, #tpu.dimension_semantics<arbitrary>], iteration_bounds = array<i64: 1, 1>, scalar_prefetch = 0 : i64, scratch_operands = 1 : i64, tpu.core_type = #tpu.core_type<tc>, window_params = [{transform_indices = @transform_0, window_bounds = array<i64: 8, 8, 16>}, {transform_indices = @transform_1, window_bounds = array<i64: 8, 8, 16>}, {pipeline_mode = #tpu.pipeline_mode<synchronous>, transform_indices = @transform_2, window_bounds = array<i64: 16, 128>}, {pipeline_mode = #tpu.pipeline_mode<synchronous>, transform_indices = @transform_3, window_bounds = array<i64: 1, 128>}, {transform_indices = @transform_4, window_bounds = array<i64: 8, 8, 128>}]} {
    %c0 = arith.constant 0 : index
    %c0_0 = arith.constant 0 : index
    %c0_1 = arith.constant 0 : index
    %0 = vector.load %arg2[%c0, %c0_0, %c0_1] : memref<8x8x16xf32, #tpu.memory_space<vmem>>, vector<8x8x16xf32>
    %1 = vector.shape_cast %0 : vector<8x8x16xf32> to vector<64x16xf32>
    %c0_2 = arith.constant 0 : index
    %c0_3 = arith.constant 0 : index
    %2 = vector.load %arg4[%c0_2, %c0_3] : memref<16x128xf32, #tpu.memory_space<vmem>>, vector<16x128xf32>
    %cst = arith.constant dense<0.000000e+00> : vector<64x128xf32>
    %3 = tpu.matmul %1, %2, %cst {dimension_numbers = #tpu.dot_dimension_numbers<[1], [0], [0], [1], [0, 0, 1, 1], [], []>} : vector<64x16xf32>, vector<16x128xf32>, vector<64x128xf32> -> vector<64x128xf32>
    %4 = vector.shape_cast %3 : vector<64x128xf32> to vector<8x8x128xf32>
    %c0_4 = arith.constant 0 : index
    %c0_5 = arith.constant 0 : index
    %c0_6 = arith.constant 0 : index
    %5 = vector.load %arg6[%c0_4, %c0_5, %c0_6] : memref<8x8x128xf32, #tpu.memory_space<vmem>>, vector<8x8x128xf32>
    tpu.vector_store %arg6[%c0_4, %c0_5, %c0_6], %4 {strides = array<i32>} : memref<8x8x128xf32, #tpu.memory_space<vmem>>, vector<8x8x128xf32>,
    %c0_i32 = arith.constant 0 : i32
    %6 = arith.cmpi eq, %arg1, %c0_i32 : i32
    %7 = arith.extui %6 : i1 to i32
    %c0_i32_7 = arith.constant 0 : i32
    %8 = arith.cmpi ne, %7, %c0_i32_7 : i32
    scf.if %8 {
      %cst_60 = arith.constant 0.000000e+00 : f32
      %110 = vector.broadcast %cst_60 : f32 to vector<8x128xf32>
      %c0_61 = arith.constant 0 : index
      %c0_62 = arith.constant 0 : index
      %111 = vector.load %arg7[%c0_61, %c0_62] : memref<8x128xf32, #tpu.memory_space<vmem>>, vector<8x128xf32>
      tpu.vector_store %arg7[%c0_61, %c0_62], %110 {strides = array<i32>} : memref<8x128xf32, #tpu.memory_space<vmem>>, vector<8x128xf32>,
    } else {
    }
    %c0_8 = arith.constant 0 : index
    %c0_9 = arith.constant 0 : index
    %9 = vector.load %arg5[%c0_8, %c0_9] : memref<1x128xf32, #tpu.memory_space<vmem>>, vector<1x128xf32>
    %c0_10 = arith.constant 0 : index
    %c0_11 = arith.constant 0 : index
    %10 = vector.load %arg7[%c0_10, %c0_11] : memref<8x128xf32, #tpu.memory_space<vmem>>, vector<8x128xf32>
    %c0_i32_12 = arith.constant 0 : i32
    %c1_i32 = arith.constant 1 : i32
    %11 = arith.addi %c0_i32_12, %c1_i32 : i32
    %c0_13 = arith.constant 0 : index
    %12 = arith.index_cast %11 : i32 to index
    %c0_14 = arith.constant 0 : index
    %13 = vector.load %arg6[%c0_13, %12, %c0_14] : memref<8x8x128xf32, #tpu.memory_space<vmem>>, vector<8x1x128xf32>
    %14 = vector.shape_cast %13 : vector<8x1x128xf32> to vector<8x128xf32>
    %15 = vector.broadcast %9 : vector<1x128xf32> to vector<8x128xf32>
    %16 = arith.mulf %10, %15 : vector<8x128xf32>
    %17 = arith.addf %16, %14 : vector<8x128xf32>
    %18 = math.tanh %17 : vector<8x128xf32>
    %c0_15 = arith.constant 0 : index
    %19 = arith.index_cast %c0_i32_12 : i32 to index
    %c0_16 = arith.constant 0 : index
    %20 = vector.load %arg6[%c0_15, %19, %c0_16] : memref<8x8x128xf32, #tpu.memory_space<vmem>>, vector<8x1x128xf32>
    %21 = vector.shape_cast %20 : vector<8x1x128xf32> to vector<8x128xf32>
    %22 = vector.shape_cast %18 : vector<8x128xf32> to vector<8x1x128xf32>
    tpu.vector_store %arg6[%c0_15, %19, %c0_16], %22 {strides = array<i32>} : memref<8x8x128xf32, #tpu.memory_space<vmem>>, vector<8x1x128xf32>,
    %c1_i32_17 = arith.constant 1 : i32
    %c1_i32_18 = arith.constant 1 : i32
    %23 = arith.addi %c1_i32_17, %c1_i32_18 : i32
    %c0_19 = arith.constant 0 : index
    %24 = arith.index_cast %23 : i32 to index
    %c0_20 = arith.constant 0 : index
    %25 = vector.load %arg6[%c0_19, %24, %c0_20] : memref<8x8x128xf32, #tpu.memory_space<vmem>>, vector<8x1x128xf32>
    %26 = vector.shape_cast %25 : vector<8x1x128xf32> to vector<8x128xf32>
    %27 = vector.broadcast %9 : vector<1x128xf32> to vector<8x128xf32>
    %28 = arith.mulf %18, %27 : vector<8x128xf32>
    %29 = arith.addf %28, %26 : vector<8x128xf32>
    %30 = math.tanh %29 : vector<8x128xf32>
    %c0_21 = arith.constant 0 : index
    %31 = arith.index_cast %c1_i32_17 : i32 to index
    %c0_22 = arith.constant 0 : index
    %32 = vector.load %arg6[%c0_21, %31, %c0_22] : memref<8x8x128xf32, #tpu.memory_space<vmem>>, vector<8x1x128xf32>
    %33 = vector.shape_cast %32 : vector<8x1x128xf32> to vector<8x128xf32>
    %34 = vector.shape_cast %30 : vector<8x128xf32> to vector<8x1x128xf32>
    tpu.vector_store %arg6[%c0_21, %31, %c0_22], %34 {strides = array<i32>} : memref<8x8x128xf32, #tpu.memory_space<vmem>>, vector<8x1x128xf32>,
    %c2_i32 = arith.constant 2 : i32
    %c1_i32_23 = arith.constant 1 : i32
    %35 = arith.addi %c2_i32, %c1_i32_23 : i32
    %c0_24 = arith.constant 0 : index
    %36 = arith.index_cast %35 : i32 to index
    %c0_25 = arith.constant 0 : index
    %37 = vector.load %arg6[%c0_24, %36, %c0_25] : memref<8x8x128xf32, #tpu.memory_space<vmem>>, vector<8x1x128xf32>
    %38 = vector.shape_cast %37 : vector<8x1x128xf32> to vector<8x128xf32>
    %39 = vector.broadcast %9 : vector<1x128xf32> to vector<8x128xf32>
    %40 = arith.mulf %30, %39 : vector<8x128xf32>
    %41 = arith.addf %40, %38 : vector<8x128xf32>
    %42 = math.tanh %41 : vector<8x128xf32>
    %c0_26 = arith.constant 0 : index
    %43 = arith.index_cast %c2_i32 : i32 to index
    %c0_27 = arith.constant 0 : index
    %44 = vector.load %arg6[%c0_26, %43, %c0_27] : memref<8x8x128xf32, #tpu.memory_space<vmem>>, vector<8x1x128xf32>
    %45 = vector.shape_cast %44 : vector<8x1x128xf32> to vector<8x128xf32>
    %46 = vector.shape_cast %42 : vector<8x128xf32> to vector<8x1x128xf32>
    tpu.vector_store %arg6[%c0_26, %43, %c0_27], %46 {strides = array<i32>} : memref<8x8x128xf32, #tpu.memory_space<vmem>>, vector<8x1x128xf32>,
    %c3_i32 = arith.constant 3 : i32
    %c1_i32_28 = arith.constant 1 : i32
    %47 = arith.addi %c3_i32, %c1_i32_28 : i32
    %c0_29 = arith.constant 0 : index
    %48 = arith.index_cast %47 : i32 to index
    %c0_30 = arith.constant 0 : index
    %49 = vector.load %arg6[%c0_29, %48, %c0_30] : memref<8x8x128xf32, #tpu.memory_space<vmem>>, vector<8x1x128xf32>
    %50 = vector.shape_cast %49 : vector<8x1x128xf32> to vector<8x128xf32>
    %51 = vector.broadcast %9 : vector<1x128xf32> to vector<8x128xf32>
    %52 = arith.mulf %42, %51 : vector<8x128xf32>
    %53 = arith.addf %52, %50 : vector<8x128xf32>
    %54 = math.tanh %53 : vector<8x128xf32>
    %c0_31 = arith.constant 0 : index
    %55 = arith.index_cast %c3_i32 : i32 to index
    %c0_32 = arith.constant 0 : index
    %56 = vector.load %arg6[%c0_31, %55, %c0_32] : memref<8x8x128xf32, #tpu.memory_space<vmem>>, vector<8x1x128xf32>
    %57 = vector.shape_cast %56 : vector<8x1x128xf32> to vector<8x128xf32>
    %58 = vector.shape_cast %54 : vector<8x128xf32> to vector<8x1x128xf32>
    tpu.vector_store %arg6[%c0_31, %55, %c0_32], %58 {strides = array<i32>} : memref<8x8x128xf32, #tpu.memory_space<vmem>>, vector<8x1x128xf32>,
    %c4_i32 = arith.constant 4 : i32
    %c1_i32_33 = arith.constant 1 : i32
    %59 = arith.addi %c4_i32, %c1_i32_33 : i32
    %c0_34 = arith.constant 0 : index
    %60 = arith.index_cast %59 : i32 to index
    %c0_35 = arith.constant 0 : index
    %61 = vector.load %arg6[%c0_34, %60, %c0_35] : memref<8x8x128xf32, #tpu.memory_space<vmem>>, vector<8x1x128xf32>
    %62 = vector.shape_cast %61 : vector<8x1x128xf32> to vector<8x128xf32>
    %63 = vector.broadcast %9 : vector<1x128xf32> to vector<8x128xf32>
    %64 = arith.mulf %54, %63 : vector<8x128xf32>
    %65 = arith.addf %64, %62 : vector<8x128xf32>
    %66 = math.tanh %65 : vector<8x128xf32>
    %c0_36 = arith.constant 0 : index
    %67 = arith.index_cast %c4_i32 : i32 to index
    %c0_37 = arith.constant 0 : index
    %68 = vector.load %arg6[%c0_36, %67, %c0_37] : memref<8x8x128xf32, #tpu.memory_space<vmem>>, vector<8x1x128xf32>
    %69 = vector.shape_cast %68 : vector<8x1x128xf32> to vector<8x128xf32>
    %70 = vector.shape_cast %66 : vector<8x128xf32> to vector<8x1x128xf32>
    tpu.vector_store %arg6[%c0_36, %67, %c0_37], %70 {strides = array<i32>} : memref<8x8x128xf32, #tpu.memory_space<vmem>>, vector<8x1x128xf32>,
    %c5_i32 = arith.constant 5 : i32
    %c1_i32_38 = arith.constant 1 : i32
    %71 = arith.addi %c5_i32, %c1_i32_38 : i32
    %c0_39 = arith.constant 0 : index
    %72 = arith.index_cast %71 : i32 to index
    %c0_40 = arith.constant 0 : index
    %73 = vector.load %arg6[%c0_39, %72, %c0_40] : memref<8x8x128xf32, #tpu.memory_space<vmem>>, vector<8x1x128xf32>
    %74 = vector.shape_cast %73 : vector<8x1x128xf32> to vector<8x128xf32>
    %75 = vector.broadcast %9 : vector<1x128xf32> to vector<8x128xf32>
    %76 = arith.mulf %66, %75 : vector<8x128xf32>
    %77 = arith.addf %76, %74 : vector<8x128xf32>
    %78 = math.tanh %77 : vector<8x128xf32>
    %c0_41 = arith.constant 0 : index
    %79 = arith.index_cast %c5_i32 : i32 to index
    %c0_42 = arith.constant 0 : index
    %80 = vector.load %arg6[%c0_41, %79, %c0_42] : memref<8x8x128xf32, #tpu.memory_space<vmem>>, vector<8x1x128xf32>
    %81 = vector.shape_cast %80 : vector<8x1x128xf32> to vector<8x128xf32>
    %82 = vector.shape_cast %78 : vector<8x128xf32> to vector<8x1x128xf32>
    tpu.vector_store %arg6[%c0_41, %79, %c0_42], %82 {strides = array<i32>} : memref<8x8x128xf32, #tpu.memory_space<vmem>>, vector<8x1x128xf32>,
    %c6_i32 = arith.constant 6 : i32
    %c1_i32_43 = arith.constant 1 : i32
    %83 = arith.addi %c6_i32, %c1_i32_43 : i32
    %c0_44 = arith.constant 0 : index
    %84 = arith.index_cast %83 : i32 to index
    %c0_45 = arith.constant 0 : index
    %85 = vector.load %arg6[%c0_44, %84, %c0_45] : memref<8x8x128xf32, #tpu.memory_space<vmem>>, vector<8x1x128xf32>
    %86 = vector.shape_cast %85 : vector<8x1x128xf32> to vector<8x128xf32>
    %87 = vector.broadcast %9 : vector<1x128xf32> to vector<8x128xf32>
    %88 = arith.mulf %78, %87 : vector<8x128xf32>
    %89 = arith.addf %88, %86 : vector<8x128xf32>
    %90 = math.tanh %89 : vector<8x128xf32>
    %c0_46 = arith.constant 0 : index
    %91 = arith.index_cast %c6_i32 : i32 to index
    %c0_47 = arith.constant 0 : index
    %92 = vector.load %arg6[%c0_46, %91, %c0_47] : memref<8x8x128xf32, #tpu.memory_space<vmem>>, vector<8x1x128xf32>
    %93 = vector.shape_cast %92 : vector<8x1x128xf32> to vector<8x128xf32>
    %94 = vector.shape_cast %90 : vector<8x128xf32> to vector<8x1x128xf32>
    tpu.vector_store %arg6[%c0_46, %91, %c0_47], %94 {strides = array<i32>} : memref<8x8x128xf32, #tpu.memory_space<vmem>>, vector<8x1x128xf32>,
    %c7_i32 = arith.constant 7 : i32
    %c0_48 = arith.constant 0 : index
    %c0_49 = arith.constant 0 : index
    %c0_50 = arith.constant 0 : index
    %95 = vector.load %arg3[%c0_48, %c0_49, %c0_50] : memref<8x8x16xf32, #tpu.memory_space<vmem>>, vector<8x1x16xf32>
    %96 = vector.shape_cast %95 : vector<8x1x16xf32> to vector<8x16xf32>
    %c0_51 = arith.constant 0 : index
    %c0_52 = arith.constant 0 : index
    %97 = vector.load %arg4[%c0_51, %c0_52] : memref<16x128xf32, #tpu.memory_space<vmem>>, vector<16x128xf32>
    %cst_53 = arith.constant dense<0.000000e+00> : vector<8x128xf32>
    %98 = tpu.matmul %96, %97, %cst_53 {dimension_numbers = #tpu.dot_dimension_numbers<[1], [0], [0], [1], [0, 0, 1, 1], [], []>} : vector<8x16xf32>, vector<16x128xf32>, vector<8x128xf32> -> vector<8x128xf32>
    %99 = vector.broadcast %9 : vector<1x128xf32> to vector<8x128xf32>
    %100 = arith.mulf %90, %99 : vector<8x128xf32>
    %101 = arith.addf %100, %98 : vector<8x128xf32>
    %102 = math.tanh %101 : vector<8x128xf32>
    %c0_i32_54 = arith.constant 0 : i32
    %103 = arith.cmpi eq, %arg1, %c0_i32_54 : i32
    %cst_55 = arith.constant 0.000000e+00 : f32
    %104 = vector.broadcast %cst_55 : f32 to vector<8x128xf32>
    %105 = arith.select %103, %104, %102 : vector<8x128xf32>
    %c0_56 = arith.constant 0 : index
    %c7 = arith.constant 7 : index
    %c0_57 = arith.constant 0 : index
    %106 = vector.load %arg6[%c0_56, %c7, %c0_57] : memref<8x8x128xf32, #tpu.memory_space<vmem>>, vector<8x1x128xf32>
    %107 = vector.shape_cast %106 : vector<8x1x128xf32> to vector<8x128xf32>
    %108 = vector.shape_cast %105 : vector<8x128xf32> to vector<8x1x128xf32>
    tpu.vector_store %arg6[%c0_56, %c7, %c0_57], %108 {strides = array<i32>} : memref<8x8x128xf32, #tpu.memory_space<vmem>>, vector<8x1x128xf32>,
    %c0_58 = arith.constant 0 : index
    %c0_59 = arith.constant 0 : index
    %109 = vector.load %arg7[%c0_58, %c0_59] : memref<8x128xf32, #tpu.memory_space<vmem>>, vector<8x128xf32>
    tpu.vector_store %arg7[%c0_58, %c0_59], %102 {strides = array<i32>} : memref<8x128xf32, #tpu.memory_space<vmem>>, vector<8x128xf32>,
    return
  }
  func.func @transform_0(%arg0: i32, %arg1: i32) -> (i32, i32, i32) {
    %c0_i32 = arith.constant 0 : i32
    %c0_i32_0 = arith.constant 0 : i32
    return %arg0, %arg1, %c0_i32 : i32, i32, i32
  }
  func.func @transform_1(%arg0: i32, %arg1: i32) -> (i32, i32, i32) {
    %c0_i32 = arith.constant 0 : i32
    %c0_i32_0 = arith.constant 0 : i32
    %c0_i32_1 = arith.constant 0 : i32
    return %arg0, %c0_i32, %c0_i32_0 : i32, i32, i32
  }
  func.func @transform_2(%arg0: i32, %arg1: i32) -> (i32, i32) {
    %c0_i32 = arith.constant 0 : i32
    %c0_i32_0 = arith.constant 0 : i32
    %c0_i32_1 = arith.constant 0 : i32
    return %c0_i32, %c0_i32_0 : i32, i32
  }
  func.func @transform_3(%arg0: i32, %arg1: i32) -> (i32, i32) {
    %c0_i32 = arith.constant 0 : i32
    %c0_i32_0 = arith.constant 0 : i32
    %c0_i32_1 = arith.constant 0 : i32
    return %c0_i32, %c0_i32_0 : i32, i32
  }
  func.func @transform_4(%arg0: i32, %arg1: i32) -> (i32, i32, i32) {
    %c0_i32 = arith.constant 0 : i32
    %c0_i32_0 = arith.constant 0 : i32
    return %arg0, %arg1, %c0_i32 : i32, i32, i32
  }
}

</mosaic_0001>

<bundles_post_ra>
// kernel: tpu_custom_call.1
= control target key start
LH: loop header
LB: loop body
LE: loop exit
PB: predicated region body
PF: predicated region fallthrough
CT: control target
= control target key end

     0   :  { %9 = vsyncpa [#allocation4], 0  ;;  %s1502_s0 = inlined_call_operand.hbm [shape: f32[8,8,16], index: 0, kind: input, shape index: {}]   ;;  %s1503_s1 = inlined_call_operand.hbm [shape: f32[8,8,16], index: 1, kind: input, shape index: {}]   ;;  %s1504_s2 = inlined_call_operand.hbm [shape: f32[16,128], index: 2, kind: input, shape index: {}]   ;;  %s1505_s3 = inlined_call_operand.vmem [shape: f32[1,128], index: 3, kind: input, shape index: {}]   ;;  %s1506_s4 = inlined_call_operand.hbm [shape: f32[8,8,128], index: 4, kind: output, shape index: {}]  }
   0x1   :  { %10 = vsyncpa [#allocation7], 0 }
   0x2   :  { %11 = vsyncpa [#allocation5], 0  ;;  %s1314_s15 = smov [#allocation6]   ;;  %s1315_s17 = smov [#allocation3]  }
   0x3   :  { %s29_s16 = sshll.u32 %s1314_s15, 4  ;;  %s17_s18 = sshll.u32 %s1315_s17, 4  ;;  %s30_s16 = int_to_ptr.vmem [resolvable:$true] %s29_s16  ;;  %s18_s18 = int_to_ptr.vmem [resolvable:$true] %s17_s18 }
   0x4   :  { %s1236_s19 = scalar_lea.vmem %s30_s16, 1024  ;;  %p1241_p1 = scmp.lt.s32.totalorder %s30_s16, %s30_s16 }
   0x5   :  { %p1237_p0 = scmp.ne.s32.totalorder %s30_s16, %s1236_s19  ;;  %p1242_p2 = scmp.lt.s32.totalorder %s1236_s19, %s1236_s19 }
   0x7   :  { %p1243_p3 = por %p1242_p2, %p1241_p1 }
   0x9   :  { %p1244_p4 = pnand %p1243_p3, %p1237_p0 }
   0xb   :  { %1247 = shalt.err (!%p1244_p4)
}
   0xc   :  { %s1316_s20 = smov 128   ;;  %s1317_s21 = smov 8  }
   0xd   :  { %35 = dma.hbm_to_vmem [thread:$0]  %s1503_s1, 1024, %s30_s16, [#allocation7], %s1316_s20, %s1316_s20, %s1317_s21  }
   0xe   :  { %s1256_s24 = scalar_lea.vmem %s18_s18, 1024  ;;  %p1261_p6 = scmp.lt.s32.totalorder %s18_s18, %s18_s18 }
   0xf   :  { %p1257_p5 = scmp.ne.s32.totalorder %s18_s18, %s1256_s24  ;;  %p1262_p7 = scmp.lt.s32.totalorder %s1256_s24, %s1256_s24 }
  0x11   :  { %p1263_p8 = por %p1262_p7, %p1261_p6 }
  0x13   :  { %p1264_p9 = pnand %p1263_p8, %p1257_p5 }
  0x15   :  { %1267 = shalt.err (!%p1264_p9)
}
  0x16   :  { %23 = dma.hbm_to_vmem [thread:$0]  %s1502_s0, 1024, %s18_s18, [#allocation4], %s1316_s20, %s1316_s20, %s1317_s21  }
  0x17   :  { %s1318_s27 = smov [#allocation8]  }
  0x18   :  { %s41_s28 = sshll.u32 %s1318_s27, 4  ;;  %s42_s28 = int_to_ptr.vmem [resolvable:$true] %s41_s28 }
  0x19   :  { %s1276_s29 = scalar_lea.vmem %s42_s28, 256  ;;  %p1281_p11 = scmp.lt.s32.totalorder %s42_s28, %s42_s28 }
  0x1a   :  { %p1277_p10 = scmp.ne.s32.totalorder %s42_s28, %s1276_s29  ;;  %p1282_p12 = scmp.lt.s32.totalorder %s1276_s29, %s1276_s29 }
  0x1c   :  { %p1283_p13 = por %p1282_p12, %p1281_p11 }
  0x1e   :  { %p1284_p0 = pnand %p1283_p13, %p1277_p10 }
  0x20   :  { %1287 = shalt.err (!%p1284_p0)
}
  0x21   :  { %47 = dma.hbm_to_vmem [thread:$0]  %s1504_s2, 256, %s42_s28, [#allocation7], %s1316_s20, %s1316_s20, %s1317_s21  }
  0x22   :  { %1308 = dma.done.wait [#allocation4], 1024  }
  0x23   :  { %1309 = vsyncadd [#allocation4], 4294966272 }
  0x24   :  { %1310 = dma.done.wait [#allocation7], 1280  }
  0x25   :  { %1311 = vsyncadd [#allocation7], 4294966016  ;;  %vm69_vm0 = vcmask 130048   ;;  %v68_v0 = vld [vmem:[#allocation8 + $0x8] sm:$0xff]  ;;  %v67_v1 = vld [vmem:[#allocation8] sm:$0xff]  ;;  %vm238_vm1 = vcmask 1041409   ;;  %v266_v35 = vlaneseq }
  0x26   :  { %v59_v2 = vld [vmem:[#allocation3] sm:$0xff]  ;;  %1178 = vmatprep.subr.mxu0 %v68_v0  ;;  %v60_v3 = vld [vmem:[#allocation3 + $0x8] sm:$0xff]  ;;  %v61_v4 = vld [vmem:[#allocation3 + $0x10] sm:$0xff]  ;;  %1201 = vmatprep.subr.mxu1 %v68_v0  ;;  %vm241_vm2 = vcmask 1042434   ;;  %v1319_v18 = vmov 0.0   ;;  %vm244_vm3 = vcmask 1043459  }
  0x27   :  { %1182 = vmatprep.mubr.msk.f32.mxu0 %vm69_vm0, %v59_v2  ;;  %1179 = vmatpush3.msra.mxu0 %v68_v0  ;;  %v65_v5 = vld [vmem:[#allocation3 + $0x30] sm:$0xff]  ;;  %v66_v6 = vld [vmem:[#allocation3 + $0x38] sm:$0xff]  ;;  %v928_v7 = vld [vmem:[#allocation6 + $0x8] sm:$0x1]  ;;  %vm1320_vm4 = vmmov 0   ;;  %vm247_vm5 = vcmask 1044484   ;;  %v1039_v47 = vcombine.high %v1319_v18, %v1319_v18 }
  0x28   :  { %1180 = vmatprep.subr.mxu0 %v67_v1  ;;  %1203 = vmatpush3.msra.mxu1 %v68_v0  ;;  %v929_v8 = vld [vmem:[#allocation6 + $0x10] sm:$0x1]  ;;  %v930_v9 = vld [vmem:[#allocation6 + $0x18] sm:$0x1]  ;;  %v931_v10 = vld [vmem:[#allocation6 + $0x20] sm:$0x1] }
  0x29   :  { %1181 = vmatpush3.msra.mxu0 %v67_v1  ;;  %1202 = vmatprep.subr.mxu1 %v67_v1  ;;  %v927_v11 = vld [vmem:[#allocation6] sm:$0x1]  ;;  %v932_v12 = vld [vmem:[#allocation6 + $0x28] sm:$0x1]  ;;  %v62_v13 = vld [vmem:[#allocation3 + $0x18] sm:$0xff]  ;;  %v945_v15 = vrot.slane %v928_v7, 7 }
  0x2a   :  { %1183 = vmatmul.mubr.msk.f32.vlgmr.msra.gmra.mxu0 %vm69_vm0, %v60_v3  ;;  %1204 = vmatpush3.msra.mxu1 %v67_v1  ;;  %v933_v14 = vld [vmem:[#allocation6 + $0x30] sm:$0x1]  ;;  %v947_v16 = vrot.slane %v929_v8, 6  ;;  %v63_v17 = vld [vmem:[#allocation3 + $0x20] sm:$0xff]  ;;  %v934_v19 = vld [vmem:[#allocation6 + $0x38] sm:$0x1] }
  0x2b   :  { %1185 = vmatprep.mubr.msk.f32.mxu0 %vm69_vm0, %v61_v4  ;;  %1191 = vmatprep.mubr.msk.f32.mxu1 %vm69_vm0, %v65_v5  ;;  %v949_v20 = vrot.slane %v930_v9, 5  ;;  %v951_v21 = vrot.slane %v931_v10, 4  ;;  %v946_v22 = vsel %vm238_vm1, %v945_v15, %v927_v11  ;;  %v953_v23 = vrot.slane %v932_v12, 3  ;;  %v64_v26 = vld [vmem:[#allocation3 + $0x28] sm:$0xff] }
  0x2c   :  { %1192 = vmatmul.mubr.msk.f32.vlgmr.msra.gmra.mxu1 %vm69_vm0, %v66_v6  ;;  %1194 = vmatprep.subr.mxu1 %v1319_v18  ;;  %vm250_vm6 = vcmask 1045509   ;;  %v948_v24 = vsel %vm241_vm2, %v947_v16, %v946_v22  ;;  %v955_v25 = vrot.slane %v933_v14, 2  ;;  %vm253_vm7 = vcmask 1046534  }
  0x2d   :  { %1195 = vmatpush3.msra.mxu1 %v68_v0  ;;  %1198 = vmatprep.mubr.msk.f32.mxu1 %vm1320_vm4, %v1319_v18  ;;  %v950_v27 = vsel %vm244_vm3, %v949_v20, %v948_v24  ;;  %v957_v28 = vrot.slane %v934_v19, 1  ;;  %vm256_vm8 = vcmask 1047559   ;;  %v1321_v33 = vmov 1966171168  }
  0x2e   :  { %1186 = vmatmul.mubr.msk.f32.gmra.mxu0 %vm69_vm0, %v62_v13  ;;  %1196 = vmatprep.subr.mxu1 %v1319_v18  ;;  %v952_v29 = vsel %vm247_vm5, %v951_v21, %v950_v27  ;;  %v264_v34 = vunpack.c.l.s4 %v1321_v33  ;;  %v267_v37 = vshrl.u32 %v266_v35, 7 }
  0x2f   :  { %1188 = vmatprep.mubr.msk.f32.mxu0 %vm69_vm0, %v63_v17  ;;  %1197 = vmatpush3.msra.mxu1 %v67_v1  ;;  %v954_v30 = vsel %vm250_vm6, %v953_v23, %v952_v29  ;;  %v1399_v23 = vld [vmem:[%s1505_s3] ss:$0 sm:$0xff]  ;;  %s1322_s3 = smov [#allocation9]  }
  0x30   :  { %v956_v31 = vsel %vm253_vm7, %v955_v25, %v954_v30  ;;  %v265_v36 = vunpack.c.0.s8 %v264_v34  ;;  %s1110_s5 = sshll.u32 %s1322_s3, 4  ;;  %s1111_s5 = int_to_ptr.vmem [resolvable:$true] %s1110_s5 }
  0x31   :  { %v958_v32 = vsel %vm256_vm8, %v957_v28, %v956_v31  ;;  %s1288_s6 = scalar_lea.vmem %s1111_s5, 1024  ;;  %p1293_p2 = scmp.lt.s32.totalorder %s1111_s5, %s1111_s5 }
  0x32   :  { %1189 = vmatmul.mubr.msk.f32.gmra.mxu0 %vm69_vm0, %v64_v26  ;;  %1199 = vmatmul.mubr.msk.f32.vlgmr.msra.gmra.mxu1 %vm69_vm0, %v958_v32  ;;  %v1382_v38 = vsub.s32 %v265_v36, %v267_v37  ;;  %v228_v32 = vmul.f32 0.0, %v1399_v23  ;;  %p1289_p1 = scmp.ne.s32.totalorder %s1111_s5, %s1288_s6  ;;  %p1294_p3 = scmp.lt.s32.totalorder %s1288_s6, %s1288_s6 }
  0x34   :  { %v1046_v40 = vrot.slane %v1319_v18, %v1382_v38  ;;  %v1053_v53 = vrot.slane %v1039_v47, %v1382_v38  ;;  %p1295_p4 = por %p1294_p3, %p1293_p2 }
  0x36   :  { %v1054_v45 = vcombine.high %v1046_v40, %v1046_v40  ;;  %v1062_v56 = vrot.slane %v1046_v40, %v1382_v38  ;;  %v1055_v60 = vcombine.high %v1053_v53, %v1053_v53  ;;  %v1069_v13 = vrot.slane %v1053_v53, %v1382_v38  ;;  %p1296_p5 = pnand %p1295_p4, %p1289_p1 }
  0x38   :  { %v1076_v49 = vrot.slane %v1054_v45, %v1382_v38  ;;  %v1084_v61 = vcombine.high %v1062_v56, %v1062_v56  ;;  %v1083_v0 = vrot.slane %v1055_v60, %v1382_v38  ;;  %v1085_v24 = vcombine.high %v1069_v13, %v1069_v13 }
  0x3a   :  { %v1086_v57 = vcombine.high %v1076_v49, %v1076_v49  ;;  %v1087_v8 = vcombine.high %v1083_v0, %v1083_v0 }
  0xea   :  { %v1184_v39 = vpop.f32.mrf.mxu0 }
  0xeb   :  { %200 = vst [vmem:[#allocation9 + $0x8] sm:$0xff] %v1184_v39 }
  0xec   :  { %v160_v41 = vpop.f32.mrf.mxu0  ;;  %v1193_v42 = vpop.f32.mrf.mxu1 }
  0xed   :  { %199 = vst [vmem:[#allocation9] sm:$0xff] %v160_v41  ;;  %206 = vst [vmem:[#allocation9 + $0x38] sm:$0xff] %v1193_v42 }
  0xee   :  { %v1187_v43 = vpop.f32.mrf.mxu0  ;;  %v190_v44 = vpop.f32.mrf.mxu1 }
  0xef   :  { %202 = vst [vmem:[#allocation9 + $0x18] sm:$0xff] %v1187_v43  ;;  %205 = vst [vmem:[#allocation9 + $0x30] sm:$0xff] %v190_v44 }
  0xf0   :  { %v170_v46 = vpop.f32.mrf.mxu0 }
  0xf1   :  { %201 = vst [vmem:[#allocation9 + $0x10] sm:$0xff] %v170_v46 }
  0xf2   :  { %v1190_v48 = vpop.f32.mrf.mxu0  ;;  %v1027_v51 = vpop.f32.mrf.mxu1  ;;  %v828_v52 = vld [vmem:[#allocation9 + $0xf] sm:$0x1]  ;;  %v215_v63 = vld [vmem:[#allocation9 + $0x9] sm:$0x1]  ;;  %v328_v31 = vld [vmem:[#allocation9 + $0xa] sm:$0x1] }
  0xf3   :  { %204 = vst [vmem:[#allocation9 + $0x28] sm:$0xff] %v1190_v48  ;;  %v844_v54 = vrot.slane %v828_v52, 7  ;;  %1162 = vst.sshfl [vmem:[#allocation9 + $0xf] sm:$0x1 pattern:$0x73625140] %v1054_v45 }
  0xf4   :  { %v180_v50 = vpop.f32.mrf.mxu0  ;;  %v1200_v55 = vpop.f32.mrf.mxu1  ;;  %v827_v58 = vld [vmem:[#allocation9 + $0x7] sm:$0x1]  ;;  %v237_v4 = vrot.slane %v215_v63, 7  ;;  %v214_v5 = vld [vmem:[#allocation9 + $0x1] sm:$0x1] }
  0xf5   :  { %203 = vst [vmem:[#allocation9 + $0x20] sm:$0xff] %v180_v50  ;;  %v845_v59 = vsel %vm238_vm1, %v844_v54, %v827_v58  ;;  %1161 = vst.sshfl [vmem:[#allocation9 + $0x7] sm:$0x1 pattern:$0x73625140] %v1046_v40  ;;  %v344_v40 = vrot.slane %v328_v31, 7 }
  0xf6   :  { %v830_v62 = vld [vmem:[#allocation9 + $0x1f] sm:$0x1]  ;;  %v217_v10 = vld [vmem:[#allocation9 + $0x19] sm:$0x1]  ;;  %v239_v12 = vsel %vm238_vm1, %v237_v4, %v214_v5  ;;  %v220_v28 = vld [vmem:[#allocation9 + $0x31] sm:$0x1] }
  0xf7   :  { %1099 = vst [vmem:[#allocation9 + $0x1f] sm:$0x1] %v1086_v57  ;;  %v848_v11 = vrot.slane %v830_v62, 5  ;;  %v834_v16 = vld [vmem:[#allocation9 + $0x3f] sm:$0x1]  ;;  %v243_v18 = vrot.slane %v217_v10, 5 }
  0xf8   :  { %v216_v1 = vld [vmem:[#allocation9 + $0x11] sm:$0x1]  ;;  %v829_v2 = vld [vmem:[#allocation9 + $0x17] sm:$0x1]  ;;  %1103 = vst [vmem:[#allocation9 + $0x3f] sm:$0x1] %v1087_v8 }
  0xf9   :  { %v846_v3 = vrot.slane %v829_v2, 6  ;;  %1098 = vst [vmem:[#allocation9 + $0x17] sm:$0x1] %v1084_v61  ;;  %v240_v6 = vrot.slane %v216_v1, 6  ;;  %v221_v25 = vld [vmem:[#allocation9 + $0x39] sm:$0x1] }
  0xfa   :  { %v832_v9 = vld [vmem:[#allocation9 + $0x2f] sm:$0x1]  ;;  %v219_v15 = vld [vmem:[#allocation9 + $0x29] sm:$0x1]  ;;  %v252_v33 = vrot.slane %v220_v28, 2  ;;  %v255_v35 = vrot.slane %v221_v25, 1 }
  0xfb   :  { %v847_v7 = vsel %vm241_vm2, %v846_v3, %v845_v59  ;;  %1164 = vst.sshfl [vmem:[#allocation9 + $0x2f] sm:$0x1 pattern:$0x73625140] %v1055_v60  ;;  %v242_v14 = vsel %vm241_vm2, %v240_v6, %v239_v12  ;;  %v249_v21 = vrot.slane %v219_v15, 3  ;;  %v852_v44 = vrot.slane %v832_v9, 3 }
  0xfc   :  { %v849_v17 = vsel %vm244_vm3, %v848_v11, %v847_v7  ;;  %v218_v19 = vld [vmem:[#allocation9 + $0x21] sm:$0x1]  ;;  %v245_v22 = vsel %vm244_vm3, %v243_v18, %v242_v14  ;;  %v831_v27 = vld [vmem:[#allocation9 + $0x27] sm:$0x1]  ;;  %v329_v34 = vld [vmem:[#allocation9 + $0x12] sm:$0x1] }
  0xfd   :  { %v246_v20 = vrot.slane %v218_v19, 4  ;;  %v850_v29 = vrot.slane %v831_v27, 4  ;;  %1163 = vst.sshfl [vmem:[#allocation9 + $0x27] sm:$0x1 pattern:$0x73625140] %v1053_v53 }
  0xfe   :  { %v833_v37 = vld [vmem:[#allocation9 + $0x37] sm:$0x1]  ;;  %v327_v42 = vld [vmem:[#allocation9 + $0x2] sm:$0x1]  ;;  %v346_v43 = vrot.slane %v329_v34, 6  ;;  %v856_v51 = vrot.slane %v834_v16, 1 }
  0xff   :  { %v248_v26 = vsel %vm247_vm5, %v246_v20, %v245_v22  ;;  %v851_v36 = vsel %vm247_vm5, %v850_v29, %v849_v17  ;;  %1102 = vst [vmem:[#allocation9 + $0x37] sm:$0x1] %v1085_v24  ;;  %v331_v46 = vld [vmem:[#allocation9 + $0x22] sm:$0x1]  ;;  %v330_v47 = vld [vmem:[#allocation9 + $0x1a] sm:$0x1]  ;;  %v345_v50 = vsel %vm238_vm1, %v344_v40, %v327_v42 }
 0x100   :  { %v251_v30 = vsel %vm250_vm6, %v249_v21, %v248_v26  ;;  %v853_v48 = vsel %vm250_vm6, %v852_v44, %v851_v36  ;;  %v854_v49 = vrot.slane %v833_v37, 2  ;;  %v347_v52 = vsel %vm241_vm2, %v346_v43, %v345_v50  ;;  %v332_v57 = vld [vmem:[#allocation9 + $0x2a] sm:$0x1]  ;;  %v333_v61 = vld [vmem:[#allocation9 + $0x32] sm:$0x1] }
 0x101   :  { %v254_v39 = vsel %vm253_vm7, %v252_v33, %v251_v30  ;;  %v350_v53 = vrot.slane %v331_v46, 4  ;;  %v348_v55 = vrot.slane %v330_v47, 5  ;;  %v352_v60 = vrot.slane %v332_v57, 3  ;;  %v334_v63 = vld [vmem:[#allocation9 + $0x3a] sm:$0x1] }
 0x102   :  { %v257_v41 = vsel %vm256_vm8, %v255_v35, %v254_v39  ;;  %v855_v54 = vsel %vm253_vm7, %v854_v49, %v853_v48  ;;  %v354_v0 = vrot.slane %v333_v61, 2  ;;  %v428_v1 = vld [vmem:[#allocation9 + $0xb] sm:$0x1]  ;;  %v356_v4 = vrot.slane %v334_v63, 1  ;;  %v429_v5 = vld [vmem:[#allocation9 + $0x13] sm:$0x1] }
 0x103   :  { %v259_v45 = vadd.f32 %v257_v41, %v228_v32  ;;  %v1412_v56 = vsel %vm256_vm8, %v856_v51, %v855_v54  ;;  %v349_v58 = vsel %vm244_vm3, %v348_v55, %v347_v52  ;;  %v444_v9 = vrot.slane %v428_v1, 7  ;;  %v427_v15 = vld [vmem:[#allocation9 + $0x3] sm:$0x1]  ;;  %v430_v22 = vld [vmem:[#allocation9 + $0x1b] sm:$0x1] }
 0x104   :  { %v351_v59 = vsel %vm247_vm5, %v350_v53, %v349_v58  ;;  %v446_v16 = vrot.slane %v429_v5, 6  ;;  %v431_v17 = vld [vmem:[#allocation9 + $0x23] sm:$0x1]  ;;  %v448_v30 = vrot.slane %v430_v22, 5  ;;  %v432_v32 = vld [vmem:[#allocation9 + $0x2b] sm:$0x1] }
 0x105   :  { %1214 = vtanh.f32 %v259_v45  ;;  %v353_v62 = vsel %vm250_vm6, %v352_v60, %v351_v59  ;;  %v445_v24 = vsel %vm238_vm1, %v444_v9, %v427_v15  ;;  %v450_v29 = vrot.slane %v431_v17, 4  ;;  %v433_v36 = vld [vmem:[#allocation9 + $0x33] sm:$0x1]  ;;  %v434_v39 = vld [vmem:[#allocation9 + $0x3b] sm:$0x1] }
 0x106   :  { %v355_v2 = vsel %vm253_vm7, %v354_v0, %v353_v62  ;;  %v447_v28 = vsel %vm241_vm2, %v446_v16, %v445_v24  ;;  %v452_v35 = vrot.slane %v432_v32, 3  ;;  %v454_v40 = vrot.slane %v433_v36, 2  ;;  %v528_v41 = vld [vmem:[#allocation9 + $0xc] sm:$0x1]  ;;  %v529_v45 = vld [vmem:[#allocation9 + $0x14] sm:$0x1] }
 0x107   :  { %v357_v10 = vsel %vm256_vm8, %v356_v4, %v355_v2  ;;  %v449_v33 = vsel %vm244_vm3, %v448_v30, %v447_v28  ;;  %v456_v44 = vrot.slane %v434_v39, 1  ;;  %v544_v49 = vrot.slane %v528_v41, 7  ;;  %v527_v55 = vld [vmem:[#allocation9 + $0x4] sm:$0x1]  ;;  %v530_v63 = vld [vmem:[#allocation9 + $0x1c] sm:$0x1] }
 0x108   :  { %v451_v34 = vsel %vm247_vm5, %v450_v29, %v449_v33  ;;  %v546_v57 = vrot.slane %v529_v45, 6  ;;  %v531_v58 = vld [vmem:[#allocation9 + $0x24] sm:$0x1]  ;;  %v628_v16 = vld [vmem:[#allocation9 + $0xd] sm:$0x1] }
 0x109   :  { %v453_v37 = vsel %vm250_vm6, %v452_v35, %v451_v34  ;;  %v545_v0 = vsel %vm238_vm1, %v544_v49, %v527_v55  ;;  %v550_v5 = vrot.slane %v531_v58, 4  ;;  %v631_v33 = vld [vmem:[#allocation9 + $0x25] sm:$0x1]  ;;  %v630_v39 = vld [vmem:[#allocation9 + $0x1d] sm:$0x1] }
 0x10a   :  { %v455_v42 = vsel %vm253_vm7, %v454_v40, %v453_v37  ;;  %v547_v4 = vsel %vm241_vm2, %v546_v57, %v545_v0  ;;  %v650_v45 = vrot.slane %v631_v33, 4  ;;  %v728_v57 = vld [vmem:[#allocation9 + $0xe] sm:$0x1] }
 0x10b   :  { %v457_v50 = vsel %vm256_vm8, %v456_v44, %v455_v42 }
 0x112   :  { %v1215_v3 = vpop.eup %1214 }
 0x113   :  { %v262_v6 = vcombine.high %v1215_v3, %v1215_v3  ;;  %v269_v7 = vrot.slane %v1215_v3, %v1382_v38  ;;  %v335_v8 = vmul.f32 %v1215_v3, %v1399_v23 }
 0x115   :  { %v276_v11 = vrot.slane %v262_v6, %v1382_v38  ;;  %v277_v12 = vcombine.high %v269_v7, %v269_v7  ;;  %v285_v13 = vrot.slane %v269_v7, %v1382_v38  ;;  %1132 = vst.sshfl [vmem:[#allocation9] sm:$0x1 pattern:$0x73625140] %v269_v7  ;;  %v359_v14 = vadd.f32 %v357_v10, %v335_v8  ;;  %v532_v8 = vld [vmem:[#allocation9 + $0x2c] sm:$0x1] }
 0x116   :  { %v548_v6 = vrot.slane %v530_v63, 5 }
 0x117   :  { %v278_v18 = vcombine.high %v276_v11, %v276_v11  ;;  %v292_v19 = vrot.slane %v276_v11, %v1382_v38  ;;  %v299_v20 = vrot.slane %v277_v12, %v1382_v38  ;;  %v307_v21 = vcombine.high %v285_v13, %v285_v13  ;;  %1133 = vst.sshfl [vmem:[#allocation9 + $0x8] sm:$0x1 pattern:$0x73625140] %v277_v12  ;;  %v533_v12 = vld [vmem:[#allocation9 + $0x34] sm:$0x1] }
 0x118   :  { %1134 = vst.sshfl [vmem:[#allocation9 + $0x20] sm:$0x1 pattern:$0x73625140] %v276_v11  ;;  %1216 = vtanh.f32 %v359_v14  ;;  %v549_v9 = vsel %vm244_vm3, %v548_v6, %v547_v4  ;;  %v552_v11 = vrot.slane %v532_v8, 3  ;;  %v554_v15 = vrot.slane %v533_v12, 2 }
 0x119   :  { %v306_v25 = vrot.slane %v278_v18, %v1382_v38  ;;  %v308_v26 = vcombine.high %v292_v19, %v292_v19  ;;  %v309_v27 = vcombine.high %v299_v20, %v299_v20  ;;  %321 = vst [vmem:[#allocation9 + $0x10] sm:$0x1] %v307_v21  ;;  %1135 = vst.sshfl [vmem:[#allocation9 + $0x28] sm:$0x1 pattern:$0x73625140] %v278_v18 }
 0x11a   :  { %v551_v10 = vsel %vm247_vm5, %v550_v5, %v549_v9  ;;  %v534_v14 = vld [vmem:[#allocation9 + $0x3c] sm:$0x1]  ;;  %v629_v20 = vld [vmem:[#allocation9 + $0x15] sm:$0x1]  ;;  %v731_v9 = vld [vmem:[#allocation9 + $0x26] sm:$0x1] }
 0x11b   :  { %v310_v31 = vcombine.high %v306_v25, %v306_v25  ;;  %322 = vst [vmem:[#allocation9 + $0x18] sm:$0x1] %v309_v27  ;;  %325 = vst [vmem:[#allocation9 + $0x30] sm:$0x1] %v308_v26  ;;  %v553_v13 = vsel %vm250_vm6, %v552_v11, %v551_v10  ;;  %v556_v19 = vrot.slane %v534_v14, 1  ;;  %v644_v25 = vrot.slane %v628_v16, 7 }
 0x11c   :  { %v555_v17 = vsel %vm253_vm7, %v554_v15, %v553_v13  ;;  %v646_v32 = vrot.slane %v629_v20, 6  ;;  %v730_v14 = vld [vmem:[#allocation9 + $0x1e] sm:$0x1]  ;;  %v750_v20 = vrot.slane %v731_v9, 4 }
 0x11d   :  { %326 = vst [vmem:[#allocation9 + $0x38] sm:$0x1] %v310_v31  ;;  %v557_v26 = vsel %vm256_vm8, %v556_v19, %v555_v17  ;;  %v627_v31 = vld [vmem:[#allocation9 + $0x5] sm:$0x1] }
 0x11e   :  { %v645_v40 = vsel %vm238_vm1, %v644_v25, %v627_v31 }
 0x11f   :  { %v647_v44 = vsel %vm241_vm2, %v646_v32, %v645_v40 }
 0x125   :  { %v1217_v43 = vpop.eup %1216 }
 0x126   :  { %v362_v46 = vcombine.high %v1217_v43, %v1217_v43  ;;  %v369_v47 = vrot.slane %v1217_v43, %v1382_v38  ;;  %v435_v48 = vmul.f32 %v1217_v43, %v1399_v23 }
 0x128   :  { %v376_v51 = vrot.slane %v362_v46, %v1382_v38  ;;  %v377_v52 = vcombine.high %v369_v47, %v369_v47  ;;  %v385_v53 = vrot.slane %v369_v47, %v1382_v38  ;;  %1136 = vst.sshfl [vmem:[#allocation9 + $0x1] sm:$0x1 pattern:$0x73625140] %v369_v47  ;;  %v459_v54 = vadd.f32 %v457_v50, %v435_v48  ;;  %v632_v48 = vld [vmem:[#allocation9 + $0x2d] sm:$0x1] }
 0x129   :  { %v648_v46 = vrot.slane %v630_v39, 5 }
 0x12a   :  { %v378_v59 = vcombine.high %v376_v51, %v376_v51  ;;  %v392_v60 = vrot.slane %v376_v51, %v1382_v38  ;;  %v399_v61 = vrot.slane %v377_v52, %v1382_v38  ;;  %v407_v62 = vcombine.high %v385_v53, %v385_v53  ;;  %1137 = vst.sshfl [vmem:[#allocation9 + $0x9] sm:$0x1 pattern:$0x73625140] %v377_v52  ;;  %v633_v52 = vld [vmem:[#allocation9 + $0x35] sm:$0x1] }
 0x12b   :  { %1138 = vst.sshfl [vmem:[#allocation9 + $0x21] sm:$0x1 pattern:$0x73625140] %v376_v51  ;;  %1218 = vtanh.f32 %v459_v54  ;;  %v649_v49 = vsel %vm244_vm3, %v648_v46, %v647_v44  ;;  %v652_v51 = vrot.slane %v632_v48, 3  ;;  %v654_v55 = vrot.slane %v633_v52, 2 }
 0x12c   :  { %v406_v1 = vrot.slane %v378_v59, %v1382_v38  ;;  %v408_v2 = vcombine.high %v392_v60, %v392_v60  ;;  %v409_v3 = vcombine.high %v399_v61, %v399_v61  ;;  %421 = vst [vmem:[#allocation9 + $0x11] sm:$0x1] %v407_v62  ;;  %1139 = vst.sshfl [vmem:[#allocation9 + $0x29] sm:$0x1 pattern:$0x73625140] %v378_v59 }
 0x12d   :  { %v651_v50 = vsel %vm247_vm5, %v650_v45, %v649_v49  ;;  %v634_v54 = vld [vmem:[#allocation9 + $0x3d] sm:$0x1]  ;;  %v729_v61 = vld [vmem:[#allocation9 + $0x16] sm:$0x1] }
 0x12e   :  { %v410_v7 = vcombine.high %v406_v1, %v406_v1  ;;  %422 = vst [vmem:[#allocation9 + $0x19] sm:$0x1] %v409_v3  ;;  %425 = vst [vmem:[#allocation9 + $0x31] sm:$0x1] %v408_v2  ;;  %v653_v53 = vsel %vm250_vm6, %v652_v51, %v651_v50  ;;  %v656_v60 = vrot.slane %v634_v54, 1  ;;  %v744_v1 = vrot.slane %v728_v57, 7 }
 0x12f   :  { %v655_v58 = vsel %vm253_vm7, %v654_v55, %v653_v53  ;;  %v746_v8 = vrot.slane %v729_v61, 6 }
 0x130   :  { %426 = vst [vmem:[#allocation9 + $0x39] sm:$0x1] %v410_v7  ;;  %v657_v2 = vsel %vm256_vm8, %v656_v60, %v655_v58  ;;  %v727_v7 = vld [vmem:[#allocation9 + $0x6] sm:$0x1] }
 0x131   :  { %v745_v15 = vsel %vm238_vm1, %v744_v1, %v727_v7 }
 0x132   :  { %v747_v19 = vsel %vm241_vm2, %v746_v8, %v745_v15 }
 0x138   :  { %v1219_v18 = vpop.eup %1218 }
 0x139   :  { %v462_v21 = vcombine.high %v1219_v18, %v1219_v18  ;;  %v469_v22 = vrot.slane %v1219_v18, %v1382_v38  ;;  %v535_v24 = vmul.f32 %v1219_v18, %v1399_v23 }
 0x13b   :  { %v476_v27 = vrot.slane %v462_v21, %v1382_v38  ;;  %v477_v28 = vcombine.high %v469_v22, %v469_v22  ;;  %v485_v29 = vrot.slane %v469_v22, %v1382_v38  ;;  %1140 = vst.sshfl [vmem:[#allocation9 + $0x2] sm:$0x1 pattern:$0x73625140] %v469_v22  ;;  %v559_v30 = vadd.f32 %v557_v26, %v535_v24  ;;  %v732_v24 = vld [vmem:[#allocation9 + $0x2e] sm:$0x1] }
 0x13c   :  { %v748_v21 = vrot.slane %v730_v14, 5 }
 0x13d   :  { %v478_v34 = vcombine.high %v476_v27, %v476_v27  ;;  %v492_v35 = vrot.slane %v476_v27, %v1382_v38  ;;  %v499_v36 = vrot.slane %v477_v28, %v1382_v38  ;;  %v507_v37 = vcombine.high %v485_v29, %v485_v29  ;;  %1141 = vst.sshfl [vmem:[#allocation9 + $0xa] sm:$0x1 pattern:$0x73625140] %v477_v28  ;;  %v733_v28 = vld [vmem:[#allocation9 + $0x36] sm:$0x1] }
 0x13e   :  { %1142 = vst.sshfl [vmem:[#allocation9 + $0x22] sm:$0x1 pattern:$0x73625140] %v476_v27  ;;  %1220 = vtanh.f32 %v559_v30  ;;  %v749_v25 = vsel %vm244_vm3, %v748_v21, %v747_v19  ;;  %v752_v27 = vrot.slane %v732_v24, 3  ;;  %v754_v31 = vrot.slane %v733_v28, 2 }
 0x13f   :  { %v506_v41 = vrot.slane %v478_v34, %v1382_v38  ;;  %v508_v42 = vcombine.high %v492_v35, %v492_v35  ;;  %v509_v43 = vcombine.high %v499_v36, %v499_v36  ;;  %521 = vst [vmem:[#allocation9 + $0x12] sm:$0x1] %v507_v37  ;;  %1143 = vst.sshfl [vmem:[#allocation9 + $0x2a] sm:$0x1 pattern:$0x73625140] %v478_v34 }
 0x140   :  { %v751_v26 = vsel %vm247_vm5, %v750_v20, %v749_v25  ;;  %v734_v30 = vld [vmem:[#allocation9 + $0x3e] sm:$0x1] }
 0x141   :  { %v510_v47 = vcombine.high %v506_v41, %v506_v41  ;;  %522 = vst [vmem:[#allocation9 + $0x1a] sm:$0x1] %v509_v43  ;;  %525 = vst [vmem:[#allocation9 + $0x32] sm:$0x1] %v508_v42  ;;  %v753_v29 = vsel %vm250_vm6, %v752_v27, %v751_v26  ;;  %v756_v34 = vrot.slane %v734_v30, 1 }
 0x142   :  { %v755_v32 = vsel %vm253_vm7, %v754_v31, %v753_v29 }
 0x143   :  { %526 = vst [vmem:[#allocation9 + $0x3a] sm:$0x1] %v510_v47  ;;  %v757_v39 = vsel %vm256_vm8, %v756_v34, %v755_v32 }
 0x14b   :  { %v1221_v59 = vpop.eup %1220 }
 0x14c   :  { %v562_v62 = vcombine.high %v1221_v59, %v1221_v59  ;;  %v569_v63 = vrot.slane %v1221_v59, %v1382_v38  ;;  %v635_v0 = vmul.f32 %v1221_v59, %v1399_v23 }
 0x14e   :  { %v576_v3 = vrot.slane %v562_v62, %v1382_v38  ;;  %v577_v4 = vcombine.high %v569_v63, %v569_v63  ;;  %v585_v5 = vrot.slane %v569_v63, %v1382_v38  ;;  %1144 = vst.sshfl [vmem:[#allocation9 + $0x3] sm:$0x1 pattern:$0x73625140] %v569_v63  ;;  %v659_v6 = vadd.f32 %v657_v2, %v635_v0 }
 0x150   :  { %v578_v10 = vcombine.high %v576_v3, %v576_v3  ;;  %v592_v11 = vrot.slane %v576_v3, %v1382_v38  ;;  %v599_v12 = vrot.slane %v577_v4, %v1382_v38  ;;  %v607_v13 = vcombine.high %v585_v5, %v585_v5  ;;  %1145 = vst.sshfl [vmem:[#allocation9 + $0xb] sm:$0x1 pattern:$0x73625140] %v577_v4 }
 0x151   :  { %1146 = vst.sshfl [vmem:[#allocation9 + $0x23] sm:$0x1 pattern:$0x73625140] %v576_v3  ;;  %1222 = vtanh.f32 %v659_v6 }
 0x152   :  { %v606_v16 = vrot.slane %v578_v10, %v1382_v38  ;;  %v608_v17 = vcombine.high %v592_v11, %v592_v11  ;;  %v609_v18 = vcombine.high %v599_v12, %v599_v12  ;;  %621 = vst [vmem:[#allocation9 + $0x13] sm:$0x1] %v607_v13  ;;  %1147 = vst.sshfl [vmem:[#allocation9 + $0x2b] sm:$0x1 pattern:$0x73625140] %v578_v10 }
 0x154   :  { %v610_v22 = vcombine.high %v606_v16, %v606_v16  ;;  %622 = vst [vmem:[#allocation9 + $0x1b] sm:$0x1] %v609_v18  ;;  %625 = vst [vmem:[#allocation9 + $0x33] sm:$0x1] %v608_v17 }
 0x156   :  { %626 = vst [vmem:[#allocation9 + $0x3b] sm:$0x1] %v610_v22 }
 0x15e   :  { %v1223_v33 = vpop.eup %1222 }
 0x15f   :  { %v662_v35 = vcombine.high %v1223_v33, %v1223_v33  ;;  %v669_v36 = vrot.slane %v1223_v33, %v1382_v38  ;;  %v735_v37 = vmul.f32 %v1223_v33, %v1399_v23 }
 0x161   :  { %v676_v40 = vrot.slane %v662_v35, %v1382_v38  ;;  %v677_v41 = vcombine.high %v669_v36, %v669_v36  ;;  %v685_v42 = vrot.slane %v669_v36, %v1382_v38  ;;  %1148 = vst.sshfl [vmem:[#allocation9 + $0x4] sm:$0x1 pattern:$0x73625140] %v669_v36  ;;  %v759_v43 = vadd.f32 %v757_v39, %v735_v37 }
 0x163   :  { %v678_v44 = vcombine.high %v676_v40, %v676_v40  ;;  %v692_v45 = vrot.slane %v676_v40, %v1382_v38  ;;  %v699_v46 = vrot.slane %v677_v41, %v1382_v38  ;;  %v707_v47 = vcombine.high %v685_v42, %v685_v42  ;;  %1149 = vst.sshfl [vmem:[#allocation9 + $0xc] sm:$0x1 pattern:$0x73625140] %v677_v41 }
 0x164   :  { %1150 = vst.sshfl [vmem:[#allocation9 + $0x24] sm:$0x1 pattern:$0x73625140] %v676_v40  ;;  %1224 = vtanh.f32 %v759_v43 }
 0x165   :  { %v706_v48 = vrot.slane %v678_v44, %v1382_v38  ;;  %v708_v49 = vcombine.high %v692_v45, %v692_v45  ;;  %v709_v50 = vcombine.high %v699_v46, %v699_v46  ;;  %721 = vst [vmem:[#allocation9 + $0x14] sm:$0x1] %v707_v47  ;;  %1151 = vst.sshfl [vmem:[#allocation9 + $0x2c] sm:$0x1 pattern:$0x73625140] %v678_v44 }
 0x167   :  { %v710_v51 = vcombine.high %v706_v48, %v706_v48  ;;  %722 = vst [vmem:[#allocation9 + $0x1c] sm:$0x1] %v709_v50  ;;  %725 = vst [vmem:[#allocation9 + $0x34] sm:$0x1] %v708_v49 }
 0x169   :  { %726 = vst [vmem:[#allocation9 + $0x3c] sm:$0x1] %v710_v51 }
 0x171   :  { %v1225_v52 = vpop.eup %1224 }
 0x172   :  { %v762_v53 = vcombine.high %v1225_v52, %v1225_v52  ;;  %v769_v54 = vrot.slane %v1225_v52, %v1382_v38  ;;  %v835_v55 = vmul.f32 %v1225_v52, %v1399_v23 }
 0x174   :  { %v776_v57 = vrot.slane %v762_v53, %v1382_v38  ;;  %v777_v58 = vcombine.high %v769_v54, %v769_v54  ;;  %v785_v59 = vrot.slane %v769_v54, %v1382_v38  ;;  %1152 = vst.sshfl [vmem:[#allocation9 + $0x5] sm:$0x1 pattern:$0x73625140] %v769_v54  ;;  %v859_v60 = vadd.f32 %v1412_v56, %v835_v55 }
 0x176   :  { %v778_v61 = vcombine.high %v776_v57, %v776_v57  ;;  %v792_v62 = vrot.slane %v776_v57, %v1382_v38  ;;  %v799_v63 = vrot.slane %v777_v58, %v1382_v38  ;;  %v807_v0 = vcombine.high %v785_v59, %v785_v59  ;;  %1153 = vst.sshfl [vmem:[#allocation9 + $0xd] sm:$0x1 pattern:$0x73625140] %v777_v58 }
 0x177   :  { %1154 = vst.sshfl [vmem:[#allocation9 + $0x25] sm:$0x1 pattern:$0x73625140] %v776_v57  ;;  %1226 = vtanh.f32 %v859_v60 }
 0x178   :  { %v806_v1 = vrot.slane %v778_v61, %v1382_v38  ;;  %v808_v23 = vcombine.high %v792_v62, %v792_v62  ;;  %v809_v2 = vcombine.high %v799_v63, %v799_v63  ;;  %821 = vst [vmem:[#allocation9 + $0x15] sm:$0x1] %v807_v0  ;;  %1155 = vst.sshfl [vmem:[#allocation9 + $0x2d] sm:$0x1 pattern:$0x73625140] %v778_v61 }
 0x17a   :  { %v810_v3 = vcombine.high %v806_v1, %v806_v1  ;;  %822 = vst [vmem:[#allocation9 + $0x1d] sm:$0x1] %v809_v2  ;;  %825 = vst [vmem:[#allocation9 + $0x35] sm:$0x1] %v808_v23 }
 0x17c   :  { %826 = vst [vmem:[#allocation9 + $0x3d] sm:$0x1] %v810_v3 }
 0x184   :  { %v1227_v56 = vpop.eup %1226 }
 0x185   :  { %v862_v4 = vcombine.high %v1227_v56, %v1227_v56  ;;  %v869_v5 = vrot.slane %v1227_v56, %v1382_v38 }
 0x187   :  { %v876_v6 = vrot.slane %v862_v4, %v1382_v38  ;;  %v877_v7 = vcombine.high %v869_v5, %v869_v5  ;;  %v885_v8 = vrot.slane %v869_v5, %v1382_v38  ;;  %1156 = vst.sshfl [vmem:[#allocation9 + $0x6] sm:$0x1 pattern:$0x73625140] %v869_v5 }
 0x189   :  { %v878_v9 = vcombine.high %v876_v6, %v876_v6  ;;  %v892_v10 = vrot.slane %v876_v6, %v1382_v38  ;;  %v899_v11 = vrot.slane %v877_v7, %v1382_v38  ;;  %v907_v12 = vcombine.high %v885_v8, %v885_v8  ;;  %1157 = vst.sshfl [vmem:[#allocation9 + $0xe] sm:$0x1 pattern:$0x73625140] %v877_v7 }
 0x18a   :  { %1158 = vst.sshfl [vmem:[#allocation9 + $0x26] sm:$0x1 pattern:$0x73625140] %v876_v6 }
 0x18b   :  { %v906_v13 = vrot.slane %v878_v9, %v1382_v38  ;;  %v908_v14 = vcombine.high %v892_v10, %v892_v10  ;;  %v909_v15 = vcombine.high %v899_v11, %v899_v11  ;;  %921 = vst [vmem:[#allocation9 + $0x16] sm:$0x1] %v907_v12  ;;  %1159 = vst.sshfl [vmem:[#allocation9 + $0x2e] sm:$0x1 pattern:$0x73625140] %v878_v9 }
 0x18d   :  { %v910_v16 = vcombine.high %v906_v13, %v906_v13  ;;  %922 = vst [vmem:[#allocation9 + $0x1e] sm:$0x1] %v909_v15  ;;  %925 = vst [vmem:[#allocation9 + $0x36] sm:$0x1] %v908_v14 }
 0x18f   :  { %926 = vst [vmem:[#allocation9 + $0x3e] sm:$0x1] %v910_v16 }
 0x190   :  { %1299 = shalt.err (!%p1296_p5)
}
 0x191   :  { %1116 = dma.vmem_to_hbm [thread:$0]  %s1111_s5, 1024, %s1506_s4, [#allocation5], %s1316_s20, %s1316_s20, %s1317_s21  }
 0x192   :  { %1312 = dma.done.wait [#allocation5], 1024  }
 0x193   :  { %1313 = vsyncadd [#allocation5], 4294966272 }
 0x194   :  { %1120 = vsyncpa [#allocation4], 1 }
 0x195   :  { %1121 = vsyncpa [#allocation7], 1 }
 0x196   :  { %1122 = vsyncpa [#allocation5], 1 }

</bundles_post_ra>
